<compile_context>
chip_gen: v7x
topology: tpu7x:2x2x1
jax: 0.10.0
libtpu: 0.0.40
codegen_flags: <defaults>
</compile_context>

<pallas_src>
import functools

import jax
import jax.numpy as jnp
from jax import lax
from jax.experimental import pallas as pl
from jax.experimental.pallas import tpu as pltpu


def _round_up(x, m):
    return (x + m - 1) // m * m


# --------------------------------------------------------------------------
# Kernel 1a (fast path): embedding table resident in VMEM, per-batch-row grid,
# in-kernel loop over L reading rows with VMEM dynamic indexing.
# ids_ref: SMEM (B*L,) int32 (scalar prefetch); emb_ref: VMEM (Vp, 1, Ep) bf16.
# --------------------------------------------------------------------------
def embed_sum_resident_kernel(ids_ref, emb_ref, out_ref, *, L):
    b = pl.program_id(0)
    ep = out_ref.shape[-1]

    def body(l, acc):
        row = ids_ref[b * L + l]
        return acc + emb_ref[row].astype(jnp.float32)      # (1, Ep)

    acc = lax.fori_loop(0, L, body, jnp.zeros((1, ep), jnp.float32),
                        unroll=(L <= 16))
    out_ref[...] = acc[None].astype(out_ref.dtype)          # (1, 1, Ep)


# --------------------------------------------------------------------------
# Kernel 1b (slow path, large vocab): table stays in HBM; rows are streamed
# through an n_buf-deep manually multi-buffered DMA pipeline.
# --------------------------------------------------------------------------
def embed_sum_stream_kernel(ids_ref, emb_hbm, out_ref, buf, sem, *, L, n_buf):
    b = pl.program_id(0)
    ep = out_ref.shape[-1]

    def fetch(l, slot):
        pltpu.make_async_copy(
            emb_hbm.at[ids_ref[b * L + l]], buf.at[slot], sem.at[slot]).start()

    # Prime the row-gather pipeline.
    for l in range(min(n_buf, L)):                           # static, tiny
        fetch(l, l)

    def body(l, acc):
        slot = lax.rem(l, n_buf)
        pltpu.make_async_copy(emb_hbm.at[0], buf.at[slot], sem.at[slot]).wait()
        acc = acc + buf[slot].astype(jnp.float32)            # (1, Ep)

        @pl.when(l + n_buf < L)
        def _():
            fetch(l + n_buf, slot)

        return acc

    acc = lax.fori_loop(0, L, body, jnp.zeros((1, ep), jnp.float32))
    out_ref[...] = acc[None].astype(out_ref.dtype)           # (1, 1, Ep)


# --------------------------------------------------------------------------
# Kernel 2: fc1 + ReLU + fc2 on a (TB, Ep) batch tile.  Weights are bf16 and
# stay resident across the batch grid (constant index_maps); accumulation and
# bias adds are f32.  The 1/L mean normalization is pre-folded into w1.
# --------------------------------------------------------------------------
def mlp_kernel(x_ref, w1_ref, b1_ref, w2_ref, b2_ref, out_ref):
    x = x_ref[...]                                                    # (TB, Ep) bf16
    h = jnp.dot(x, w1_ref[...], preferred_element_type=jnp.float32)  # (TB, Hp) f32
    h = jnp.maximum(h + b1_ref[...], 0.0)
    out = jnp.dot(h.astype(jnp.bfloat16), w2_ref[...],
                  preferred_element_type=jnp.float32)                 # (TB, Cp) f32
    out_ref[...] = (out + b2_ref[...]).astype(out_ref.dtype)


def simple_classifier(text_ids, emb, w1, b1, w2, b2):
    """text_ids: (B, L) int32.
    emb: (V, E) f32  (nn.Embedding.weight)
    w1:  (H, E) f32, b1: (H,) f32   (nn.Linear -> weight is (out, in))
    w2:  (C, H) f32, b2: (C,) f32
    Returns logits (B, C) float32."""
    B, L = text_ids.shape
    V, E = emb.shape
    H = w1.shape[0]
    C = w2.shape[0]

    # Padded, lane/sublane-aligned sizes (256-align big H/C for v6e/v7x MXU).
    Ep = _round_up(E, 128)
    Hp = _round_up(H, 256) if H >= 256 else _round_up(H, 128)
    Cp = _round_up(C, 256) if C >= 256 else _round_up(C, 128)
    Vp = _round_up(V, 8)

    Bp = _round_up(B, 8)
    if Bp >= 256:
        TB = 128
    elif Bp >= 16:
        TB = _round_up(Bp // 2, 8)      # >= 2 parallel tiles for v7x's 2 TCs
    else:
        TB = Bp
    Bp = _round_up(Bp, TB)

    # ---- layout plumbing (pure JAX, outside the kernels) ----
    ids_flat = text_ids.astype(jnp.int32).reshape(B * L)   # 1D -> compact SMEM
    emb_p = jnp.zeros((Vp, 1, Ep), jnp.bfloat16).at[:V, 0, :E].set(
        emb.astype(jnp.bfloat16))
    inv_l = 1.0 / L
    w1_p = jnp.zeros((Ep, Hp), jnp.bfloat16).at[:E, :H].set(
        (w1.T * inv_l).astype(jnp.bfloat16))                # fold 1/L into fc1
    b1_p = jnp.zeros((1, Hp), jnp.float32).at[0, :H].set(b1)
    w2_p = jnp.zeros((Hp, Cp), jnp.bfloat16).at[:H, :C].set(
        w2.T.astype(jnp.bfloat16))
    b2_p = jnp.zeros((1, Cp), jnp.float32).at[0, :C].set(b2)

    # ---- Kernel 1: gather + sum over L -> (B, 1, Ep) bf16 ----
    # Resident-table fast path budget: each (1, Ep) row pads to 8 sublanes in
    # VMEM and Pallas may double-buffer the block, so charge Vp*8*Ep*2*2 bytes.
    table_vmem_bytes = Vp * 8 * Ep * 2 * 2
    use_resident_table = table_vmem_bytes <= 12 * 1024 * 1024

    if use_resident_table:
        sums = pl.pallas_call(
            functools.partial(embed_sum_resident_kernel, L=L),
            out_shape=jax.ShapeDtypeStruct((B, 1, Ep), jnp.bfloat16),
            grid_spec=pltpu.PrefetchScalarGridSpec(
                num_scalar_prefetch=1,
                grid=(B,),
                in_specs=[
                    # Whole table, constant index_map -> loaded once, resident.
                    pl.BlockSpec((Vp, 1, Ep), lambda b, ids: (0, 0, 0)),
                ],
                out_specs=pl.BlockSpec((1, 1, Ep), lambda b, ids: (b, 0, 0)),
            ),
            compiler_params=pltpu.CompilerParams(
                dimension_semantics=("parallel",)),
        )(ids_flat, emb_p)
    else:
        NBUF = 4
        sums = pl.pallas_call(
            functools.partial(embed_sum_stream_kernel, L=L, n_buf=NBUF),
            out_shape=jax.ShapeDtypeStruct((B, 1, Ep), jnp.bfloat16),
            grid_spec=pltpu.PrefetchScalarGridSpec(
                num_scalar_prefetch=1,
                grid=(B,),
                in_specs=[pl.BlockSpec(memory_space=pl.ANY)],  # table in HBM
                out_specs=pl.BlockSpec((1, 1, Ep), lambda b, ids: (b, 0, 0)),
                scratch_shapes=[
                    pltpu.VMEM((NBUF, 1, Ep), jnp.bfloat16),
                    pltpu.SemaphoreType.DMA((NBUF,)),
                ],
            ),
            compiler_params=pltpu.CompilerParams(
                dimension_semantics=("arbitrary",)),
        )(ids_flat, emb_p)

    # bf16 activations for the MXU; pad batch up to Bp for kernel 2.
    x_p = jnp.zeros((Bp, Ep), jnp.bfloat16).at[:B].set(sums.reshape(B, Ep))

    # ---- Kernel 2: batch-tiled MLP head -> (Bp, Cp) f32 ----
    # TODO(synk): for very large E/H on v7x (64 MiB VMEM), add a K-axis grid
    # over Ep chunks with an f32 accumulator instead of fully resident weights.
    logits_p = pl.pallas_call(
        mlp_kernel,
        out_shape=jax.ShapeDtypeStruct((Bp, Cp), jnp.float32),
        grid_spec=pltpu.PrefetchScalarGridSpec(
            num_scalar_prefetch=0,
            grid=(Bp // TB,),
            in_specs=[
                pl.BlockSpec((TB, Ep), lambda i: (i, 0)),   # activations
                pl.BlockSpec((Ep, Hp), lambda i: (0, 0)),   # fc1 weight (resident)
                pl.BlockSpec((1, Hp), lambda i: (0, 0)),    # fc1 bias
                pl.BlockSpec((Hp, Cp), lambda i: (0, 0)),   # fc2 weight (resident)
                pl.BlockSpec((1, Cp), lambda i: (0, 0)),    # fc2 bias
            ],
            out_specs=pl.BlockSpec((TB, Cp), lambda i: (i, 0)),
        ),
        compiler_params=pltpu.CompilerParams(
            dimension_semantics=("parallel",)),
    )(x_p, w1_p, b1_p, w2_p, b2_p)

    return logits_p[:B, :C]


if __name__ == "__main__":
    # Small shapes consistent with the module's forward.
    vocab_size, embedding_dim, hidden_dim, num_classes = 64, 32, 32, 4
    batch, seq = 2, 8

    key = jax.random.PRNGKey(0)
    k_ids, k_emb, k_w1, k_b1, k_w2, k_b2 = jax.random.split(key, 6)

    text = jax.random.randint(k_ids, (batch, seq), 0, vocab_size, dtype=jnp.int32)

    # Deterministic parameter init (shapes match nn.Embedding / nn.Linear).
    emb = jax.random.normal(k_emb, (vocab_size, embedding_dim), jnp.float32) * 0.1
    w1 = jax.random.normal(k_w1, (hidden_dim, embedding_dim), jnp.float32) * 0.1  # (out, in)
    b1 = jax.random.normal(k_b1, (hidden_dim,), jnp.float32) * 0.1
    w2 = jax.random.normal(k_w2, (num_classes, hidden_dim), jnp.float32) * 0.1
    b2 = jax.random.normal(k_b2, (num_classes,), jnp.float32) * 0.1

    logits = simple_classifier(text, emb, w1, b1, w2, b2)
    logits = jax.block_until_ready(logits)

    # Pure-JAX f32 reference.
    embedded = jnp.take(emb, text, axis=0)                 # (B, L, E)
    x = embedded.mean(axis=1)                              # (B, E)
    h = jnp.maximum(x @ w1.T + b1, 0.0)                    # (B, H)
    ref = h @ w2.T + b2                                    # (B, C)

    assert logits.shape == (batch, num_classes)
    # Kernel uses bf16 table/activations/weights with f32 accumulation -> loose tol.
    assert jnp.allclose(logits, ref, atol=1e-2, rtol=1e-2), (logits, ref)
    print("KERNEL_OK")
</pallas_src>

<mosaic_0001>
module attributes {stable_mosaic.version = 11 : i64} {
  func.func @embed_sum_resident_kernel(%arg0: i32, %arg1: memref<16xi32, #tpu.memory_space<smem>>, %arg2: memref<64x1x128xbf16, #tpu.memory_space<vmem>>, %arg3: memref<1x1x128xbf16, #tpu.memory_space<vmem>>) attributes {dimension_semantics = [#tpu.dimension_semantics<parallel>], iteration_bounds = array<i64: 2>, scalar_prefetch = 1 : i64, scratch_operands = 0 : i64, tpu.core_type = #tpu.core_type<tc>, window_params = [{pipeline_mode = #tpu.pipeline_mode<synchronous>, transform_indices = @transform_0, window_bounds = array<i64: 64, 1, 128>}, {transform_indices = @transform_1, window_bounds = array<i64: 1, 1, 128>}]} {
    %cst = arith.constant 0.000000e+00 : f32
    %0 = vector.broadcast %cst : f32 to vector<1x128xf32>
    %c0_i32 = arith.constant 0 : i32
    %c8_i32 = arith.constant 8 : i32
    %1 = arith.muli %arg0, %c8_i32 : i32
    %2 = arith.addi %1, %c0_i32 : i32
    %3 = arith.index_cast %2 : i32 to index
    %4 = memref.load %arg1[%3] : memref<16xi32, #tpu.memory_space<smem>>
    %5 = arith.index_cast %4 : i32 to index
    %c0 = arith.constant 0 : index
    %c0_0 = arith.constant 0 : index
    %6 = vector.load %arg2[%5, %c0, %c0_0] : memref<64x1x128xbf16, #tpu.memory_space<vmem>>, vector<1x1x128xbf16>
    %7 = vector.shape_cast %6 : vector<1x1x128xbf16> to vector<1x128xbf16>
    %8 = arith.extf %7 : vector<1x128xbf16> to vector<1x128xf32>
    %9 = arith.addf %0, %8 : vector<1x128xf32>
    %c1_i32 = arith.constant 1 : i32
    %c8_i32_1 = arith.constant 8 : i32
    %10 = arith.muli %arg0, %c8_i32_1 : i32
    %11 = arith.addi %10, %c1_i32 : i32
    %12 = arith.index_cast %11 : i32 to index
    %13 = memref.load %arg1[%12] : memref<16xi32, #tpu.memory_space<smem>>
    %14 = arith.index_cast %13 : i32 to index
    %c0_2 = arith.constant 0 : index
    %c0_3 = arith.constant 0 : index
    %15 = vector.load %arg2[%14, %c0_2, %c0_3] : memref<64x1x128xbf16, #tpu.memory_space<vmem>>, vector<1x1x128xbf16>
    %16 = vector.shape_cast %15 : vector<1x1x128xbf16> to vector<1x128xbf16>
    %17 = arith.extf %16 : vector<1x128xbf16> to vector<1x128xf32>
    %18 = arith.addf %9, %17 : vector<1x128xf32>
    %c2_i32 = arith.constant 2 : i32
    %c8_i32_4 = arith.constant 8 : i32
    %19 = arith.muli %arg0, %c8_i32_4 : i32
    %20 = arith.addi %19, %c2_i32 : i32
    %21 = arith.index_cast %20 : i32 to index
    %22 = memref.load %arg1[%21] : memref<16xi32, #tpu.memory_space<smem>>
    %23 = arith.index_cast %22 : i32 to index
    %c0_5 = arith.constant 0 : index
    %c0_6 = arith.constant 0 : index
    %24 = vector.load %arg2[%23, %c0_5, %c0_6] : memref<64x1x128xbf16, #tpu.memory_space<vmem>>, vector<1x1x128xbf16>
    %25 = vector.shape_cast %24 : vector<1x1x128xbf16> to vector<1x128xbf16>
    %26 = arith.extf %25 : vector<1x128xbf16> to vector<1x128xf32>
    %27 = arith.addf %18, %26 : vector<1x128xf32>
    %c3_i32 = arith.constant 3 : i32
    %c8_i32_7 = arith.constant 8 : i32
    %28 = arith.muli %arg0, %c8_i32_7 : i32
    %29 = arith.addi %28, %c3_i32 : i32
    %30 = arith.index_cast %29 : i32 to index
    %31 = memref.load %arg1[%30] : memref<16xi32, #tpu.memory_space<smem>>
    %32 = arith.index_cast %31 : i32 to index
    %c0_8 = arith.constant 0 : index
    %c0_9 = arith.constant 0 : index
    %33 = vector.load %arg2[%32, %c0_8, %c0_9] : memref<64x1x128xbf16, #tpu.memory_space<vmem>>, vector<1x1x128xbf16>
    %34 = vector.shape_cast %33 : vector<1x1x128xbf16> to vector<1x128xbf16>
    %35 = arith.extf %34 : vector<1x128xbf16> to vector<1x128xf32>
    %36 = arith.addf %27, %35 : vector<1x128xf32>
    %c4_i32 = arith.constant 4 : i32
    %c8_i32_10 = arith.constant 8 : i32
    %37 = arith.muli %arg0, %c8_i32_10 : i32
    %38 = arith.addi %37, %c4_i32 : i32
    %39 = arith.index_cast %38 : i32 to index
    %40 = memref.load %arg1[%39] : memref<16xi32, #tpu.memory_space<smem>>
    %41 = arith.index_cast %40 : i32 to index
    %c0_11 = arith.constant 0 : index
    %c0_12 = arith.constant 0 : index
    %42 = vector.load %arg2[%41, %c0_11, %c0_12] : memref<64x1x128xbf16, #tpu.memory_space<vmem>>, vector<1x1x128xbf16>
    %43 = vector.shape_cast %42 : vector<1x1x128xbf16> to vector<1x128xbf16>
    %44 = arith.extf %43 : vector<1x128xbf16> to vector<1x128xf32>
    %45 = arith.addf %36, %44 : vector<1x128xf32>
    %c5_i32 = arith.constant 5 : i32
    %c8_i32_13 = arith.constant 8 : i32
    %46 = arith.muli %arg0, %c8_i32_13 : i32
    %47 = arith.addi %46, %c5_i32 : i32
    %48 = arith.index_cast %47 : i32 to index
    %49 = memref.load %arg1[%48] : memref<16xi32, #tpu.memory_space<smem>>
    %50 = arith.index_cast %49 : i32 to index
    %c0_14 = arith.constant 0 : index
    %c0_15 = arith.constant 0 : index
    %51 = vector.load %arg2[%50, %c0_14, %c0_15] : memref<64x1x128xbf16, #tpu.memory_space<vmem>>, vector<1x1x128xbf16>
    %52 = vector.shape_cast %51 : vector<1x1x128xbf16> to vector<1x128xbf16>
    %53 = arith.extf %52 : vector<1x128xbf16> to vector<1x128xf32>
    %54 = arith.addf %45, %53 : vector<1x128xf32>
    %c6_i32 = arith.constant 6 : i32
    %c8_i32_16 = arith.constant 8 : i32
    %55 = arith.muli %arg0, %c8_i32_16 : i32
    %56 = arith.addi %55, %c6_i32 : i32
    %57 = arith.index_cast %56 : i32 to index
    %58 = memref.load %arg1[%57] : memref<16xi32, #tpu.memory_space<smem>>
    %59 = arith.index_cast %58 : i32 to index
    %c0_17 = arith.constant 0 : index
    %c0_18 = arith.constant 0 : index
    %60 = vector.load %arg2[%59, %c0_17, %c0_18] : memref<64x1x128xbf16, #tpu.memory_space<vmem>>, vector<1x1x128xbf16>
    %61 = vector.shape_cast %60 : vector<1x1x128xbf16> to vector<1x128xbf16>
    %62 = arith.extf %61 : vector<1x128xbf16> to vector<1x128xf32>
    %63 = arith.addf %54, %62 : vector<1x128xf32>
    %c7_i32 = arith.constant 7 : i32
    %c8_i32_19 = arith.constant 8 : i32
    %64 = arith.muli %arg0, %c8_i32_19 : i32
    %65 = arith.addi %64, %c7_i32 : i32
    %66 = arith.index_cast %65 : i32 to index
    %67 = memref.load %arg1[%66] : memref<16xi32, #tpu.memory_space<smem>>
    %68 = arith.index_cast %67 : i32 to index
    %c0_20 = arith.constant 0 : index
    %c0_21 = arith.constant 0 : index
    %69 = vector.load %arg2[%68, %c0_20, %c0_21] : memref<64x1x128xbf16, #tpu.memory_space<vmem>>, vector<1x1x128xbf16>
    %70 = vector.shape_cast %69 : vector<1x1x128xbf16> to vector<1x128xbf16>
    %71 = arith.extf %70 : vector<1x128xbf16> to vector<1x128xf32>
    %72 = arith.addf %63, %71 : vector<1x128xf32>
    %c8_i32_22 = arith.constant 8 : i32
    %73 = vector.shape_cast %72 : vector<1x128xf32> to vector<1x1x128xf32>
    %74 = arith.truncf %73 : vector<1x1x128xf32> to vector<1x1x128xbf16>
    %c0_23 = arith.constant 0 : index
    %c0_24 = arith.constant 0 : index
    %c0_25 = arith.constant 0 : index
    %75 = vector.load %arg3[%c0_23, %c0_24, %c0_25] : memref<1x1x128xbf16, #tpu.memory_space<vmem>>, vector<1x1x128xbf16>
    tpu.vector_store %arg3[%c0_23, %c0_24, %c0_25], %74 {strides = array<i32>} : memref<1x1x128xbf16, #tpu.memory_space<vmem>>, vector<1x1x128xbf16>,
    return
  }
  func.func @transform_0(%arg0: i32, %arg1: memref<16xi32, #tpu.memory_space<smem>>) -> (i32, i32, i32) {
    %c0_i32 = arith.constant 0 : i32
    %c0_i32_0 = arith.constant 0 : i32
    %c0_i32_1 = arith.constant 0 : i32
    %c0_i32_2 = arith.constant 0 : i32
    return %c0_i32, %c0_i32_0, %c0_i32_1 : i32, i32, i32
  }
  func.func @transform_1(%arg0: i32, %arg1: memref<16xi32, #tpu.memory_space<smem>>) -> (i32, i32, i32) {
    %c0_i32 = arith.constant 0 : i32
    %c0_i32_0 = arith.constant 0 : i32
    %c0_i32_1 = arith.constant 0 : i32
    return %arg0, %c0_i32, %c0_i32_0 : i32, i32, i32
  }
}

</mosaic_0001>

<bundles_post_ra>
// kernel: tpu_custom_call.1
= control target key start
LH: loop header
LB: loop body
LE: loop exit
PB: predicated region body
PF: predicated region fallthrough
CT: control target
= control target key end

     0   :  { %s298_s0 = inlined_call_operand.vmem [shape: s32[16], index: 0, kind: input, shape index: {}]   ;;  %s299_s1 = inlined_call_operand.vmem [shape: bf16[64,1,128], index: 1, kind: input, shape index: {}]   ;;  %s300_s2 = inlined_call_operand.vmem [shape: bf16[2,1,128], index: 2, kind: output, shape index: {}]  }
   0x1   :  { %s7_s11 = sshll.u32 %s298_s0, 4  ;;  %s8_s11 = int_to_ptr.vmem [resolvable:$true] %s7_s11 }
   0x2   :  { %s214_s12 = scalar_lea.vmem %s8_s11, 16  ;;  %p219_p1 = scmp.lt.s32.totalorder %s8_s11, %s8_s11 }
   0x3   :  { %p215_p0 = scmp.ne.s32.totalorder %s8_s11, %s214_s12  ;;  %p220_p2 = scmp.lt.s32.totalorder %s214_s12, %s214_s12 }
   0x5   :  { %p221_p3 = por %p220_p2, %p219_p1 }
   0x7   :  { %p222_p4 = pnand %p221_p3, %p215_p0 }
   0x9   :  { %225 = shalt.err (!%p222_p4)  }
   0xa   :  { %s236_s13 = smov [#allocation3]  }
   0xb   :  { %10 = dma.vmem_to_smem %s8_s11, 16, %s236_s13, [#allocation2] }
   0xc   :  { %230 = dma.done.wait [#allocation2], 16 }
   0xd   :  { %231 = vsyncadd [#allocation2], 4294967280 }
   0xe   :  { %12 = sfence }
   0xf   :  { %s255_s14 = smov 0  }
  0x10 LB: > { %s261_s0 = sadd.s32 4294967295, %s234_s14   ;;  %p201_p5 = scmp.ge.s32.totalorder %s234_s14, 1  ;;  %s234_s14 = sphi %s255_s14, %s18_s14  }
  0x11   : > { %p84_p6 = scmp.lt.s32.totalorder %s234_s14, 3 }
  0x13   : > { %p85_p7 = pnand %p201_p5, %p84_p6 }
  0x14   : > { %s202_s15 = sshll.u32 (!%p85_p7), %s261_s0, 3  ;;  %p97_p8 = scmp.lt.s32.totalorder (!%p85_p7), %s261_s0, 1  ;;  %vm149_vm0 = vcmask (!%p85_p7), 1040384   ;;  %vm150_vm1 = vsmask.f32 (!%p85_p7), 256 }
  0x15   : > { %88 = sbr.rel (%p85_p7) target bundleno = 51 (0x33), region = 24  ;;  %s101_s16 = sld [smem:[#allocation3 + %s202_s15]] (!%p85_p7)  ;;  %vm151_vm2 = vmand (!%p85_p7), %vm149_vm0, %vm150_vm1 }
  0x16   : > { %s106_s17 = sadd.s32 (!%p85_p7), 1, %s202_s15  ;;  %s112_s19 = sadd.s32 (!%p85_p7), 2, %s202_s15 }
  0x17   : > { %s107_s18 = sld [smem:[#allocation3 + %s106_s17]] (!%p85_p7)  ;;  %s118_s21 = sadd.s32 (!%p85_p7), 3, %s202_s15 }
  0x18   : > { %s113_s20 = sld [smem:[#allocation3 + %s112_s19]] (!%p85_p7)  ;;  %s124_s22 = sadd.s32 (!%p85_p7), 4, %s202_s15 }
  0x19   : > { %s119_s23 = sld [smem:[#allocation3 + %s118_s21]] (!%p85_p7)  ;;  %s130_s28 = sadd.s32 (!%p85_p7), 5, %s202_s15 }
  0x1a   : > { %s125_s24 = sld [smem:[#allocation3 + %s124_s22]] (!%p85_p7)  ;;  %s136_s30 = sadd.s32 (!%p85_p7), 6, %s202_s15 }
  0x1b   : > { %s102_s27 = scalar_lea.vmem (!%p85_p7), %s299_s1, %s101_s16  ;;  %s131_s29 = sld [smem:[#allocation3 + %s130_s28]] (!%p85_p7) }
  0x1c   : > { %v103_v0 = vld [vmem:[%s102_s27] sm:$0x1]  ;;  %s137_s6 = sld [smem:[#allocation3 + %s136_s30]]  ;;  %s142_s10 = sadd.s32 7, %s202_s15 }
  0x1d   : > { %v104_v1 = vunpack.c.l.bf16 %v103_v0  ;;  %s108_s5 = scalar_lea.vmem %s299_s1, %s107_s18  ;;  %s143_s11 = sld [smem:[#allocation3 + %s142_s10]] }
  0x1e   : > { %v109_v2 = vld [vmem:[%s108_s5] sm:$0x1]  ;;  %s114_s9 = scalar_lea.vmem %s299_s1, %s113_s20  ;;  %s302_s0 = smov (!%p97_p8, %s261_s0), 1 }
  0x1f   : > { %v110_v3 = vunpack.c.l.bf16 %v109_v2  ;;  %v115_v4 = vld [vmem:[%s114_s9] sm:$0x1]  ;;  %s120_s16 = scalar_lea.vmem %s299_s1, %s119_s23  ;;  %s99_s30 = scalar_lea.vmem %s300_s2, %s302_s0 }
  0x20   : > { %v116_v5 = vunpack.c.l.bf16 %v115_v4  ;;  %s126_s18 = scalar_lea.vmem %s299_s1, %s125_s24  ;;  %v121_v7 = vld [vmem:[%s120_s16] sm:$0x1] }
  0x21   : > { %v111_v6 = vadd.f32 %v110_v3, %v104_v1  ;;  %v127_v8 = vld [vmem:[%s126_s18] sm:$0x1]  ;;  %v122_v9 = vunpack.c.l.bf16 %v121_v7  ;;  %s132_s15 = scalar_lea.vmem %s299_s1, %s131_s29 }
  0x22   : > { %v128_v11 = vunpack.c.l.bf16 %v127_v8  ;;  %v133_v12 = vld [vmem:[%s132_s15] sm:$0x1]  ;;  %s138_s23 = scalar_lea.vmem %s299_s1, %s137_s6 }
  0x23   : > { %v117_v10 = vadd.f32 %v116_v5, %v111_v6  ;;  %v139_v13 = vld [vmem:[%s138_s23] sm:$0x1]  ;;  %v134_v15 = vunpack.c.l.bf16 %v133_v12  ;;  %s144_s27 = scalar_lea.vmem %s299_s1, %s143_s11 }
  0x24   : > { %v145_v16 = vld [vmem:[%s144_s27] sm:$0x1]  ;;  %v140_v18 = vunpack.c.l.bf16 %v139_v13 }
  0x25   : > { %v123_v14 = vadd.f32 %v122_v9, %v117_v10  ;;  %v146_v20 = vunpack.c.l.bf16 %v145_v16  ;;  %v152_v23 = vld [vmem:[%s99_s30] sm:$0x1] }
  0x27   : > { %v129_v17 = vadd.f32 %v128_v11, %v123_v14 }
  0x29   : > { %v135_v19 = vadd.f32 %v134_v15, %v129_v17 }
  0x2b   : > { %v141_v21 = vadd.f32 %v140_v18, %v135_v19 }
  0x2d   : > { %v147_v22 = vadd.f32 %v146_v20, %v141_v21 }
  0x2f   : > { %v148_v24 = vpack.c.bf16 %v147_v22, %v147_v22 }
  0x31   : > { %v153_v25 = vsel %vm151_vm2, %v148_v24, %v152_v23 }
  0x32   : > { %154 = vst [vmem:[%s99_s30] sm:$0x1] %v153_v25 }
  0x33 PF: > { %s18_s14 = sadd.s32 1, %s234_s14  }
  0x34   : > { %p15_p9 = scmp.ge.s32.totalorder %s18_s14, 4  }
  0x36   :  { %17 = sbr.rel (!%p15_p9) target bundleno = 16 (0x10), region = 59 }

</bundles_post_ra>
